<compile_context>
chip_gen: v6e
topology: v6e:2x2x1
jax: 0.10.0
libtpu: 0.0.40
codegen_flags: <defaults>
</compile_context>

<pallas_src>
import functools

import jax
import jax.numpy as jnp
from jax.experimental import pallas as pl
from jax.experimental.pallas import tpu as pltpu

_SUBLANE = 8
_LANE = 128


def _round_up(v, m):
    return (v + m - 1) // m * m


def _pick_vmem_limit_bytes():
    """96 MiB on 128-MiB-VMEM chips (v4/v5e/v6e); 48 MiB otherwise (v7x has 64 MiB/TC)."""
    try:
        kind = jax.devices()[0].device_kind.lower()
    except Exception:  # pragma: no cover
        kind = ""
    if any(t in kind for t in ("v4", "v5", "v6")):
        return 96 * 1024 * 1024
    return 48 * 1024 * 1024


# ---------------------------------------------------------------------------
# Kernels
# ---------------------------------------------------------------------------
def _fc_leaky_relu_kernel_single_k(x_ref, w_ref, b_ref, o_ref, *, negative_slope):
    """Whole K in one tile: fused matmul + bias + leaky-ReLU, no accumulator."""
    y = jnp.dot(x_ref[...], w_ref[...], preferred_element_type=jnp.float32)
    y = y + b_ref[...].astype(jnp.float32)
    o_ref[...] = jnp.where(y > 0, y, negative_slope * y).astype(o_ref.dtype)


def _fc_leaky_relu_kernel_acc(x_ref, w_ref, b_ref, o_ref, acc_ref, *, negative_slope):
    """K-tiled reduction path with a resident f32 accumulator."""
    k = pl.program_id(2)

    @pl.when(k == 0)
    def _():
        acc_ref[...] = jnp.broadcast_to(b_ref[...].astype(jnp.float32), acc_ref.shape)

    acc_ref[...] += jnp.dot(x_ref[...], w_ref[...], preferred_element_type=jnp.float32)

    @pl.when(k == pl.num_programs(2) - 1)
    def _():
        y = acc_ref[...]
        o_ref[...] = jnp.where(y > 0, y, negative_slope * y).astype(o_ref.dtype)


# ---------------------------------------------------------------------------
# One-time parameter preparation (NOT on the hot path)
# ---------------------------------------------------------------------------
def prepare_fc_params(weight, bias, *, tk=1024, compute_dtype=None):
    """Transpose PyTorch-layout weight (D_out, D_in) -> (D_in, D_out), cast, and
    zero-pad K only if the K-reduction path (D_in > tk) will be used.
    Bias stays f32 (it is added into the f32 accumulator)."""
    D_out, D_in = weight.shape
    if compute_dtype is not None:
        weight = weight.astype(compute_dtype)  # cast BEFORE any padding
    w_t = weight.T  # (D_in, D_out)
    if D_in > tk:
        Kp = _round_up(D_in, tk)
        if Kp != D_in:
            w_t = jnp.pad(w_t, ((0, Kp - D_in), (0, 0)))
    b2d = bias.astype(jnp.float32).reshape(1, D_out)
    return w_t, b2d


# ---------------------------------------------------------------------------
# Forward pass
# ---------------------------------------------------------------------------
def fc_leaky_relu(
    x,
    w_t,          # prepared weight, (Kp, D_out)   (Kp == D_in unless K-padded at prep)
    b2d,          # prepared bias,   (1, D_out) f32
    *,
    tm=512,
    tn=512,
    tk=1024,      # must match the tk used in prepare_fc_params
    negative_slope=0.01,
    compute_dtype=None,   # e.g. jnp.bfloat16 on v6e/v7x (f32 accumulation kept)
):
    """leaky_relu(x @ W.T + b) where w_t = W.T was prepared by prepare_fc_params."""
    B, D_in = x.shape
    Kp, D_out = w_t.shape
    out_dtype = x.dtype

    if compute_dtype is not None:
        x = x.astype(compute_dtype)

    # Clamp tiles for small problems (sublane multiple of 8, lane multiple of 128).
    tm = min(tm, _round_up(B, _SUBLANE))
    tn = min(tn, _round_up(D_out, _LANE))

    vmem_limit = _pick_vmem_limit_bytes()
    k_collapsed = (Kp == D_in) and (D_in <= tk)

    if k_collapsed:
        # Single K block == full D_in extent -> no K padding required at all.
        grid = (pl.cdiv(D_out, tn), pl.cdiv(B, tm))  # N outer, M inner: weight resident
        return pl.pallas_call(
            functools.partial(
                _fc_leaky_relu_kernel_single_k, negative_slope=negative_slope
            ),
            out_shape=jax.ShapeDtypeStruct((B, D_out), out_dtype),
            grid_spec=pltpu.PrefetchScalarGridSpec(
                num_scalar_prefetch=0,
                grid=grid,
                in_specs=[
                    pl.BlockSpec((tm, D_in), lambda j, i: (i, 0)),   # x: depends on M
                    pl.BlockSpec((D_in, tn), lambda j, i: (0, j)),   # W.T: const over inner M
                    pl.BlockSpec((1, tn), lambda j, i: (0, j)),      # bias: depends on N
                ],
                out_specs=pl.BlockSpec((tm, tn), lambda j, i: (i, j)),
            ),
            compiler_params=pltpu.CompilerParams(
                dimension_semantics=("parallel", "parallel"),
                vmem_limit_bytes=vmem_limit,
            ),
        )(x, w_t, b2d)

    # ---- K-reduction path (large D_in) ----
    # Only K needs zero padding for correctness (garbage K columns would corrupt
    # real outputs); M/N ragged tails are handled by cdiv grids + masked stores.
    if x.shape[1] != Kp:
        x = jnp.pad(x, ((0, 0), (0, Kp - x.shape[1])))

    grid = (pl.cdiv(D_out, tn), pl.cdiv(B, tm), Kp // tk)
    return pl.pallas_call(
        functools.partial(_fc_leaky_relu_kernel_acc, negative_slope=negative_slope),
        out_shape=jax.ShapeDtypeStruct((B, D_out), out_dtype),
        grid_spec=pltpu.PrefetchScalarGridSpec(
            num_scalar_prefetch=0,
            grid=grid,
            in_specs=[
                pl.BlockSpec((tm, tk), lambda j, i, k: (i, k)),
                pl.BlockSpec((tk, tn), lambda j, i, k: (k, j)),
                pl.BlockSpec((1, tn), lambda j, i, k: (0, j)),
            ],
            out_specs=pl.BlockSpec((tm, tn), lambda j, i, k: (i, j)),
            scratch_shapes=[pltpu.VMEM((tm, tn), jnp.float32)],
        ),
        compiler_params=pltpu.CompilerParams(
            dimension_semantics=("parallel", "parallel", "arbitrary"),
            vmem_limit_bytes=vmem_limit,
        ),
    )(x, w_t, b2d)
    # TODO(synk): if profiling shows exposed DMA, add pipeline_mode=pl.Buffered(3) to
    # the x/weight BlockSpecs (verify against v7x's 64 MiB VMEM budget first).


if __name__ == "__main__":
    def _leaky_ref(x, weight, bias):
        y = x @ weight.T + bias
        return jnp.where(y > 0, y, 0.01 * y)

    key = jax.random.PRNGKey(0)
    k1, k2, k3, k4, k5, k6 = jax.random.split(key, 6)

    # ---- Test 1: module-sized shapes (Linear(32, 16), batch 8) -> K-collapsed path.
    B, D_in, D_out = 8, 32, 16
    x = jax.random.normal(k1, (B, D_in), dtype=jnp.float32)
    bound = 1.0 / (D_in ** 0.5)
    weight = jax.random.uniform(k2, (D_out, D_in), jnp.float32, -bound, bound)
    bias = jax.random.uniform(k3, (D_out,), jnp.float32, -bound, bound)

    w_t, b2d = prepare_fc_params(weight, bias)          # one-time param prep
    out = jax.jit(lambda a, w, b: fc_leaky_relu(a, w, b))(x, w_t, b2d)
    out = jax.block_until_ready(out)
    assert out.shape == (B, D_out)
    assert jnp.allclose(out, _leaky_ref(x, weight, bias), atol=1e-5, rtol=1e-5)

    # ---- Test 2: small shape forced onto the K-reduction path (tk=128, D_in=256).
    B2, D_in2, D_out2 = 8, 256, 64
    x2 = jax.random.normal(k4, (B2, D_in2), dtype=jnp.float32)
    bound2 = 1.0 / (D_in2 ** 0.5)
    weight2 = jax.random.uniform(k5, (D_out2, D_in2), jnp.float32, -bound2, bound2)
    bias2 = jax.random.uniform(k6, (D_out2,), jnp.float32, -bound2, bound2)

    w_t2, b2d2 = prepare_fc_params(weight2, bias2, tk=128)
    out2 = jax.jit(lambda a, w, b: fc_leaky_relu(a, w, b, tk=128))(x2, w_t2, b2d2)
    out2 = jax.block_until_ready(out2)
    assert out2.shape == (B2, D_out2)
    assert jnp.allclose(out2, _leaky_ref(x2, weight2, bias2), atol=1e-4, rtol=1e-4)

    print("KERNEL_OK")
</pallas_src>

<mosaic_0001>
module attributes {stable_mosaic.version = 11 : i64} {
  func.func @_fc_leaky_relu_kernel_single_k(%arg0: i32, %arg1: i32, %arg2: memref<8x32xf32, #tpu.memory_space<vmem>>, %arg3: memref<32x128xf32, #tpu.memory_space<vmem>>, %arg4: memref<1x128xf32, #tpu.memory_space<vmem>>, %arg5: memref<8x128xf32, #tpu.memory_space<vmem>>) attributes {dimension_semantics = [#tpu.dimension_semantics<parallel>, #tpu.dimension_semantics<parallel>], iteration_bounds = array<i64: 1, 1>, scalar_prefetch = 0 : i64, scratch_operands = 0 : i64, tpu.core_type = #tpu.core_type<tc>, window_params = [{transform_indices = @transform_0, window_bounds = array<i64: 8, 32>}, {transform_indices = @transform_1, window_bounds = array<i64: 32, 128>}, {transform_indices = @transform_2, window_bounds = array<i64: 1, 128>}, {transform_indices = @transform_3, window_bounds = array<i64: 8, 128>}]} {
    %c0 = arith.constant 0 : index
    %c0_0 = arith.constant 0 : index
    %0 = vector.load %arg2[%c0, %c0_0] : memref<8x32xf32, #tpu.memory_space<vmem>>, vector<8x32xf32>
    %c0_1 = arith.constant 0 : index
    %c0_2 = arith.constant 0 : index
    %1 = vector.load %arg3[%c0_1, %c0_2] : memref<32x128xf32, #tpu.memory_space<vmem>>, vector<32x128xf32>
    %cst = arith.constant dense<0.000000e+00> : vector<8x128xf32>
    %2 = tpu.matmul %0, %1, %cst {dimension_numbers = #tpu.dot_dimension_numbers<[1], [0], [0], [1], [0, 0, 1, 1], [], []>} : vector<8x32xf32>, vector<32x128xf32>, vector<8x128xf32> -> vector<8x128xf32>
    %c0_3 = arith.constant 0 : index
    %c0_4 = arith.constant 0 : index
    %3 = vector.load %arg4[%c0_3, %c0_4] : memref<1x128xf32, #tpu.memory_space<vmem>>, vector<1x128xf32>
    %4 = vector.broadcast %3 : vector<1x128xf32> to vector<8x128xf32>
    %5 = arith.addf %2, %4 : vector<8x128xf32>
    %cst_5 = arith.constant 0.000000e+00 : f32
    %6 = vector.broadcast %cst_5 : f32 to vector<8x128xf32>
    %7 = arith.cmpf ogt, %5, %6 : vector<8x128xf32>
    %cst_6 = arith.constant 0.00999999977 : f32
    %8 = vector.broadcast %cst_6 : f32 to vector<8x128xf32>
    %9 = arith.mulf %8, %5 : vector<8x128xf32>
    %10 = arith.select %7, %5, %9 : vector<8x128xi1>, vector<8x128xf32>
    %c0_7 = arith.constant 0 : index
    %c0_8 = arith.constant 0 : index
    %11 = vector.load %arg5[%c0_7, %c0_8] : memref<8x128xf32, #tpu.memory_space<vmem>>, vector<8x128xf32>
    tpu.vector_store %arg5[%c0_7, %c0_8], %10 {strides = array<i32>} : memref<8x128xf32, #tpu.memory_space<vmem>>, vector<8x128xf32>,
    return
  }
  func.func @transform_0(%arg0: i32, %arg1: i32) -> (i32, i32) {
    %c0_i32 = arith.constant 0 : i32
    %c0_i32_0 = arith.constant 0 : i32
    return %arg1, %c0_i32 : i32, i32
  }
  func.func @transform_1(%arg0: i32, %arg1: i32) -> (i32, i32) {
    %c0_i32 = arith.constant 0 : i32
    %c0_i32_0 = arith.constant 0 : i32
    return %c0_i32, %arg0 : i32, i32
  }
  func.func @transform_2(%arg0: i32, %arg1: i32) -> (i32, i32) {
    %c0_i32 = arith.constant 0 : i32
    %c0_i32_0 = arith.constant 0 : i32
    return %c0_i32, %arg0 : i32, i32
  }
  func.func @transform_3(%arg0: i32, %arg1: i32) -> (i32, i32) {
    %c0_i32 = arith.constant 0 : i32
    return %arg1, %arg0 : i32, i32
  }
}

</mosaic_0001>

<bundles_post_ra>
// kernel: _lambda_.1
= control target key start
LH: loop header
LB: loop body
LE: loop exit
PB: predicated region body
PF: predicated region fallthrough
CT: control target
= control target key end

     0   :  { %v162_v1 = vmov 0.0   ;;  %vm163_vm0 = vmmov 0   ;;  %s206_s0 = inlined_call_operand.vmem [shape: f32[8,32], index: 0, kind: input, shape index: {}]   ;;  %s207_s1 = inlined_call_operand.vmem [shape: f32[32,16], index: 1, kind: input, shape index: {}]   ;;  %s208_s2 = inlined_call_operand.vmem [shape: f32[1,16], index: 2, kind: input, shape index: {}]   ;;  %s209_s3 = inlined_call_operand.hbm [shape: f32[8,16], index: 3, kind: output, shape index: {}]  }
   0x1   :  { %v19_v0 = vld [vmem:[%s207_s1 + $0x18] sm:$0xff]  ;;  %126 = vmatprep.subr.mxu0 %v162_v1  ;;  %v18_v2 = vld [vmem:[%s207_s1 + $0x10] sm:$0xff]  ;;  %134 = vmatprep.mubr.msk.f32.mxu0 %vm163_vm0, %v162_v1 }
   0x2   :  { %127 = vmatpush3.msra.mxu0 %v19_v0 }
   0x3   :  { %8 = vsyncpa [#allocation3], 0  ;;  %128 = vmatprep.subr.mxu0 %v162_v1  ;;  %v17_v3 = vld [vmem:[%s207_s1 + $0x8] sm:$0xff]  ;;  %v16_v4 = vld [vmem:[%s207_s1] sm:$0xff]  ;;  %vm27_vm1 = vcmask 261120   ;;  %s164_s24 = smov [#allocation2]  }
   0x4   :  { %129 = vmatpush3.msra.mxu0 %v18_v2  ;;  %v15_v5 = vld [vmem:[%s206_s0] sm:$0xff]  ;;  %s111_s25 = sshll.u32 %s164_s24, 4  ;;  %s112_s25 = int_to_ptr.vmem [resolvable:$true] %s111_s25 }
   0x5   :  { %130 = vmatprep.subr.mxu0 %v162_v1  ;;  %v119_v6 = vld [vmem:[%s208_s2] ss:$0 sm:$0xff]  ;;  %s140_s1 = scalar_lea.vmem %s112_s25, 128  ;;  %p145_p1 = scmp.lt.s32.totalorder %s112_s25, %s112_s25 }
   0x6   :  { %131 = vmatpush3.msra.mxu0 %v17_v3  ;;  %p141_p0 = scmp.ne.s32.totalorder %s112_s25, %s140_s1  ;;  %p146_p2 = scmp.lt.s32.totalorder %s140_s1, %s140_s1 }
   0x7   :  { %132 = vmatprep.subr.mxu0 %v162_v1 }
   0x8   :  { %133 = vmatpush3.msra.mxu0 %v16_v4  ;;  %p147_p3 = por %p146_p2, %p145_p1 }
   0x9   :  { %135 = vmatmul.mubr.msk.f32.vlgmr.msra.gmra.mxu0 %vm27_vm1, %v15_v5 }
   0xa   :  { %p148_p4 = pnand %p147_p3, %p141_p0 }
  0xc9   :  { %v97_v7 = vpop.f32.mrf.mxu0 }
  0xca   :  { %v98_v8 = vadd.f32 %v119_v6, %v97_v7 }
  0xcb   :  { %v136_v9 = vpop.f32.mrf.mxu0 }
  0xcc   :  { %v102_v10 = vmul.f32 0.01, %v98_v8  ;;  %vm101_vm2 = vcmp.gt.f32.partialorder %v98_v8, 0.0 }
  0xce   :  { %v103_v11 = vsel %vm101_vm2, %v98_v8, %v102_v10 }
  0xcf   :  { %104 = vst [vmem:[#allocation2] sm:$0xff] %v103_v11 }
  0xd0   :  { %151 = shalt.err (!%p148_p4)
}
  0xd1   :  { %114 = dma.vmem_to_hbm [thread:$0]  %s112_s25, 128, %s209_s3, [#allocation3]  }
  0xd2   :  { %160 = dma.done.wait [#allocation3], 128  }
  0xd3   :  { %161 = vsyncadd [#allocation3], 4294967168 }
  0xd4   :  { %118 = vsyncpa [#allocation3], 1 }

</bundles_post_ra>
